<compile_context>
chip_gen: v7x
topology: tpu7x:2x2x1
jax: 0.10.0
libtpu: 0.0.40
codegen_flags: <defaults>
</compile_context>

<pallas_src>
import functools

import jax
import jax.numpy as jnp
from jax.experimental import pallas as pl
from jax.experimental.pallas import tpu as pltpu


# ---------------------------------------------------------------------------
# Hardware probing (generation-aware VMEM budget / TensorCore count).
# ---------------------------------------------------------------------------
def _device_kind() -> str:
    try:
        return jax.devices()[0].device_kind.lower()
    except Exception:
        return ""


def _vmem_capacity_bytes() -> int:
    try:
        info = pltpu.get_tpu_info()
        cap = getattr(info, "vmem_capacity_bytes", None)
        if cap:
            return int(cap)
    except Exception:
        pass
    kind = _device_kind()
    if "v7" in kind:
        return 64 * 1024 * 1024          # v7x: 64 MiB per TensorCore
    if "v2" in kind or "v3" in kind or "v4" in kind:
        return 32 * 1024 * 1024
    return 128 * 1024 * 1024             # v5e / v6e


def _num_tensorcores() -> int:
    kind = _device_kind()
    return 2 if ("v7" in kind or "v4" in kind or "v3" in kind) else 1


# ---------------------------------------------------------------------------
# Kernel
# ---------------------------------------------------------------------------
def _attention_pool_kernel(x_ref, wt_ref, o_ref, *, out_mode: str,
                           inv_seq_len: float, exp_dtype):
    # x_ref:  (TB, S, D) block of embeddings
    # wt_ref: (D, D) pre-transposed Linear weight (resident, constant index)
    # o_ref:  (TB, D) lane-dense output slab
    tb, s, d = x_ref.shape

    x = x_ref[...]                                    # (TB, S, D)
    x32 = x.astype(jnp.float32)

    # attention_scores = embeddings @ W^T : tall (TB*S, D) MXU matmul against
    # the resident (bf16 by default) weight; f32 accumulation.
    x2 = x.reshape(tb * s, d).astype(wt_ref.dtype)
    scores = jnp.dot(x2, wt_ref[...], preferred_element_type=jnp.float32)
    scores = scores.reshape(tb, s, d)                 # (TB, S, D)

    # softmax over the sequence axis with the normalization fused into the
    # final reduction (attn / weighted are never materialized).
    m = jnp.max(scores, axis=1, keepdims=True)        # (TB, 1, D)
    z = scores - m
    if exp_dtype is not None:                         # opt-in bf16 exp (v6e/v7x)
        z = z.astype(exp_dtype)
    e = jnp.exp(z).astype(jnp.float32)                # (TB, S, D), > 0
    den = jnp.sum(e, axis=1)                          # (TB, D), strictly > 0
    xe = x32 * e                                      # (TB, S, D)

    if out_mode == "max":
        # max_s(x*e)/den == max_s(x*e/den) ONLY because den > 0 per lane
        # (e = exp(.) > 0 everywhere); keep this invariant if padding/masking
        # sequence positions is ever added.
        num = jnp.max(xe, axis=1)
    else:
        num = jnp.sum(xe, axis=1)

    res = num / den                                   # exact division
    if out_mode == "mean":
        res = res * inv_seq_len

    o_ref[...] = res.astype(o_ref.dtype)              # dense (TB, D) store


# ---------------------------------------------------------------------------
# Tile picker — budgets the real per-step VMEM working set.
# ---------------------------------------------------------------------------
def _pick_tile_b(B, S, D, *, x_bytes, w_bytes, out_bytes,
                 vmem_budget_bytes, num_cores, weight_bufs=1):
    def vmem_needed(tb):
        rows = tb * S
        inp = 2 * rows * D * x_bytes                 # double-buffered input block
        wgt = weight_bufs * D * D * w_bytes          # resident weight block(s)
        outp = 2 * tb * D * out_bytes                # double-buffered output block
        inter = rows * D * (4 * 4 + 2)               # ~4 live f32 + 1 bf16 intermediates
        return inp + wgt + outp + inter

    fits = [t for t in range(1, B + 1)
            if B % t == 0 and vmem_needed(t) <= vmem_budget_bytes]
    if not fits:
        # TODO(synk): online-softmax S-split (arbitrary S grid axis + running
        # max/den/num scratch finalized via pl.when) for very long sequences.
        return 1

    # Prefer sublane-friendly output blocks (TB == B or TB % 8 == 0).
    friendly = [t for t in fits if t == B or t % 8 == 0] or fits
    best = max(friendly)
    if num_cores > 1:
        # Keep grid steps a multiple of the TC count so the "parallel" batch
        # axis shards across TensorCores (v7x: 2 TCs). On 1-TC chips just take
        # the biggest tile.
        sharded = [t for t in friendly if (B // t) % num_cores == 0]
        if sharded:
            best = max(sharded)
    return best


# ---------------------------------------------------------------------------
# Wrapper
# ---------------------------------------------------------------------------
def attention_pool_per_dimension(embeddings: jax.Array,
                                 weight: jax.Array,
                                 out: str = "mean",
                                 *,
                                 mxu_dtype=jnp.bfloat16,
                                 exp_dtype=None,
                                 tile_b: int | None = None) -> jax.Array:
    """
    embeddings: (B, S, D) float32
    weight:     (D, D)   -- nn.Linear(D, D, bias=False).weight
    out:        'mean' | 'sum' | 'max'
    mxu_dtype:  dtype of matmul operands (default bf16; pass None for f32
                parity). Accumulation is always f32.
    exp_dtype:  optional dtype for the exp input (e.g. jnp.bfloat16 on v6e/v7x
                if a bundle dump shows EUP is the binding slot). Default f32.
    returns:    (B, D) in embeddings.dtype
    """
    out = out.lower()
    if out not in {"mean", "sum", "max"}:
        raise ValueError(f"Invalid value for `out`: {out}.")

    B, S, D = embeddings.shape
    assert weight.shape == (D, D)
    out_dtype = embeddings.dtype

    # Lane-dense padding: pad D up to a multiple of 128 so reshapes are
    # copy-free, vregs are full and the (TB, D) store is an unmasked vst.
    # Zero-padding is exact: padded score columns are 0 everywhere, so padded
    # weighted columns are 0 and get sliced off below.
    Dp = 128 * pl.cdiv(D, 128)
    x_p = embeddings if Dp == D else jnp.pad(
        embeddings, ((0, 0), (0, 0), (0, Dp - D)))

    # nn.Linear computes x @ W^T; transpose (and pad) once outside the kernel.
    wt = jnp.transpose(weight)
    if Dp != D:
        wt = jnp.pad(wt, ((0, Dp - D), (0, Dp - D)))
    if mxu_dtype is not None:
        wt = wt.astype(mxu_dtype)        # bf16 MXU operands by default

    # Generation-aware VMEM budgeting.
    vmem_cap = _vmem_capacity_bytes()
    vmem_limit = (vmem_cap * 3) // 4     # ~25% headroom for compiler scratch
    tile_budget = (vmem_cap * 2) // 5    # ~51 MiB v5e/v6e, ~25 MiB v7x
    num_cores = _num_tensorcores()

    tb = tile_b if tile_b is not None else _pick_tile_b(
        B, S, Dp,
        x_bytes=x_p.dtype.itemsize,
        w_bytes=wt.dtype.itemsize,
        out_bytes=jnp.dtype(out_dtype).itemsize,
        vmem_budget_bytes=tile_budget,
        num_cores=num_cores,
        weight_bufs=1)
    assert B % tb == 0, (B, tb)

    kernel = functools.partial(_attention_pool_kernel, out_mode=out,
                               inv_seq_len=1.0 / S, exp_dtype=exp_dtype)

    def make_call(single_buffer_weight: bool):
        if single_buffer_weight:
            # Constant block index -> weight DMA'd once; single-buffer it so a
            # large (D, D) weight doesn't burn 2x VMEM on a dead second buffer.
            w_spec = pl.BlockSpec((Dp, Dp), lambda b: (0, 0),
                                  pipeline_mode=pl.Buffered(1))
        else:
            w_spec = pl.BlockSpec((Dp, Dp), lambda b: (0, 0))
        return pl.pallas_call(
            kernel,
            out_shape=jax.ShapeDtypeStruct((B, Dp), out_dtype),
            grid_spec=pltpu.PrefetchScalarGridSpec(
                num_scalar_prefetch=0,
                grid=(B // tb,),
                in_specs=[
                    # per-step batch tile of (padded) embeddings
                    pl.BlockSpec((tb, S, Dp), lambda b: (b, 0, 0)),
                    w_spec,
                ],
                # lane-dense 2-D output slab
                out_specs=pl.BlockSpec((tb, Dp), lambda b: (b, 0)),
            ),
            compiler_params=pltpu.CompilerParams(
                dimension_semantics=("parallel",),
                vmem_limit_bytes=vmem_limit,
            ),
        )

    try:
        y = make_call(True)(x_p, wt)
    except Exception:
        # Fallback for jax versions without BlockSpec pipeline_mode support.
        y = make_call(False)(x_p, wt)

    return y if Dp == D else y[:, :D]


# ---------------------------------------------------------------------------
# Reference + self-test
# ---------------------------------------------------------------------------
def _reference(embeddings, weight, out="mean"):
    scores = jnp.einsum("bsd,kd->bsk", embeddings, weight,
                        precision=jax.lax.Precision.HIGHEST)
    attn = jax.nn.softmax(scores, axis=1)
    weighted = embeddings * attn
    if out == "max":
        return jnp.max(weighted, axis=1)
    if out == "sum":
        return jnp.sum(weighted, axis=1)
    return jnp.mean(weighted, axis=1)


if __name__ == "__main__":
    key = jax.random.PRNGKey(0)
    k_x, k_w, k_x2 = jax.random.split(key, 3)

    # module-consistent small shapes: batch=2, seq_len=8, input_dim=32
    B, S, D = 2, 8, 32
    x = jax.random.normal(k_x, (B, S, D), dtype=jnp.float32)
    w = jax.random.normal(k_w, (D, D), dtype=jnp.float32) * (1.0 / jnp.sqrt(D))

    # Tolerance covers the default bf16 MXU operands (f32 accumulation).
    for mode in ("mean", "sum", "max"):
        y = jax.block_until_ready(attention_pool_per_dimension(x, w, out=mode))
        y_ref = _reference(x, w, out=mode)
        assert y.shape == (B, D), y.shape
        assert jnp.allclose(y, y_ref, atol=2e-2, rtol=5e-2), f"mismatch ({mode})"

    # larger batch exercises the multi-batch tile and the tile picker
    B2 = 64
    x2 = jax.random.normal(k_x2, (B2, S, D), dtype=jnp.float32)
    y2 = jax.block_until_ready(attention_pool_per_dimension(x2, w, out="mean"))
    y2_ref = _reference(x2, w, out="mean")
    assert y2.shape == (B2, D)
    assert jnp.allclose(y2, y2_ref, atol=2e-2, rtol=5e-2), "mismatch (tiled batch)"

    print("KERNEL_OK")
</pallas_src>

<mosaic_0001>
module attributes {stable_mosaic.version = 11 : i64} {
  func.func @_attention_pool_kernel(%arg0: i32, %arg1: memref<2x8x128xf32, #tpu.memory_space<vmem>>, %arg2: memref<128x128xbf16, #tpu.memory_space<vmem>>, %arg3: memref<2x128xf32, #tpu.memory_space<vmem>>) attributes {dimension_semantics = [#tpu.dimension_semantics<parallel>], iteration_bounds = array<i64: 1>, scalar_prefetch = 0 : i64, scratch_operands = 0 : i64, tpu.core_type = #tpu.core_type<tc>, window_params = [{transform_indices = @transform_0, window_bounds = array<i64: 2, 8, 128>}, {pipeline_mode = #tpu.pipeline_mode<synchronous>, transform_indices = @transform_1, window_bounds = array<i64: 128, 128>}, {transform_indices = @transform_2, window_bounds = array<i64: 2, 128>}]} {
    %c0 = arith.constant 0 : index
    %c0_0 = arith.constant 0 : index
    %c0_1 = arith.constant 0 : index
    %0 = vector.load %arg1[%c0, %c0_0, %c0_1] : memref<2x8x128xf32, #tpu.memory_space<vmem>>, vector<2x8x128xf32>
    %1 = vector.shape_cast %0 : vector<2x8x128xf32> to vector<16x128xf32>
    %2 = arith.truncf %1 : vector<16x128xf32> to vector<16x128xbf16>
    %c0_2 = arith.constant 0 : index
    %c0_3 = arith.constant 0 : index
    %3 = vector.load %arg2[%c0_2, %c0_3] : memref<128x128xbf16, #tpu.memory_space<vmem>>, vector<128x128xbf16>
    %cst = arith.constant dense<0.000000e+00> : vector<16x128xf32>
    %4 = tpu.matmul %2, %3, %cst {dimension_numbers = #tpu.dot_dimension_numbers<[1], [0], [0], [1], [0, 0, 1, 1], [], []>} : vector<16x128xbf16>, vector<128x128xbf16>, vector<16x128xf32> -> vector<16x128xf32>
    %5 = vector.shape_cast %4 : vector<16x128xf32> to vector<2x8x128xf32>
    %cst_4 = arith.constant dense<0xFF800000> : vector<2x128xf32>
    %6 = vector.multi_reduction <maximumf>, %5, %cst_4 [1] : vector<2x8x128xf32> to vector<2x128xf32>
    %7 = vector.shape_cast %6 : vector<2x128xf32> to vector<2x1x128xf32>
    %8 = vector.broadcast %7 : vector<2x1x128xf32> to vector<2x8x128xf32>
    %9 = arith.subf %5, %8 : vector<2x8x128xf32>
    %10 = math.exp %9 : vector<2x8x128xf32>
    %cst_5 = arith.constant dense<0.000000e+00> : vector<2x128xf32>
    %11 = vector.multi_reduction <add>, %10, %cst_5 [1] : vector<2x8x128xf32> to vector<2x128xf32>
    %12 = arith.mulf %0, %10 : vector<2x8x128xf32>
    %cst_6 = arith.constant dense<0.000000e+00> : vector<2x128xf32>
    %13 = vector.multi_reduction <add>, %12, %cst_6 [1] : vector<2x8x128xf32> to vector<2x128xf32>
    %14 = arith.divf %13, %11 : vector<2x128xf32>
    %cst_7 = arith.constant 1.250000e-01 : f32
    %15 = vector.broadcast %cst_7 : f32 to vector<2x128xf32>
    %16 = arith.mulf %14, %15 : vector<2x128xf32>
    %c0_8 = arith.constant 0 : index
    %c0_9 = arith.constant 0 : index
    %17 = vector.load %arg3[%c0_8, %c0_9] : memref<2x128xf32, #tpu.memory_space<vmem>>, vector<2x128xf32>
    tpu.vector_store %arg3[%c0_8, %c0_9], %16 {strides = array<i32>} : memref<2x128xf32, #tpu.memory_space<vmem>>, vector<2x128xf32>,
    return
  }
  func.func @transform_0(%arg0: i32) -> (i32, i32, i32) {
    %c0_i32 = arith.constant 0 : i32
    %c0_i32_0 = arith.constant 0 : i32
    %c0_i32_1 = arith.constant 0 : i32
    return %arg0, %c0_i32, %c0_i32_0 : i32, i32, i32
  }
  func.func @transform_1(%arg0: i32) -> (i32, i32) {
    %c0_i32 = arith.constant 0 : i32
    %c0_i32_0 = arith.constant 0 : i32
    %c0_i32_1 = arith.constant 0 : i32
    return %c0_i32, %c0_i32_0 : i32, i32
  }
  func.func @transform_2(%arg0: i32) -> (i32, i32) {
    %c0_i32 = arith.constant 0 : i32
    %c0_i32_0 = arith.constant 0 : i32
    return %arg0, %c0_i32 : i32, i32
  }
}

module attributes {stable_mosaic.version = 11 : i64} {
  func.func @_attention_pool_kernel(%arg0: i32, %arg1: memref<2x8x128xf32, #tpu.memory_space<vmem>>, %arg2: memref<128x128xbf16, #tpu.memory_space<vmem>>, %arg3: memref<2x128xf32, #tpu.memory_space<vmem>>) attributes {dimension_semantics = [#tpu.dimension_semantics<parallel>], iteration_bounds = array<i64: 1>, scalar_prefetch = 0 : i64, scratch_operands = 0 : i64, tpu.core_type = #tpu.core_type<tc>, window_params = [{transform_indices = @transform_0, window_bounds = array<i64: 2, 8, 128>}, {pipeline_mode = #tpu.pipeline_mode<synchronous>, transform_indices = @transform_1, window_bounds = array<i64: 128, 128>}, {transform_indices = @transform_2, window_bounds = array<i64: 2, 128>}]} {
    %c0 = arith.constant 0 : index
    %c0_0 = arith.constant 0 : index
    %c0_1 = arith.constant 0 : index
    %0 = vector.load %arg1[%c0, %c0_0, %c0_1] : memref<2x8x128xf32, #tpu.memory_space<vmem>>, vector<2x8x128xf32>
    %1 = vector.shape_cast %0 : vector<2x8x128xf32> to vector<16x128xf32>
    %2 = arith.truncf %1 : vector<16x128xf32> to vector<16x128xbf16>
    %c0_2 = arith.constant 0 : index
    %c0_3 = arith.constant 0 : index
    %3 = vector.load %arg2[%c0_2, %c0_3] : memref<128x128xbf16, #tpu.memory_space<vmem>>, vector<128x128xbf16>
    %cst = arith.constant dense<0.000000e+00> : vector<16x128xf32>
    %4 = tpu.matmul %2, %3, %cst {dimension_numbers = #tpu.dot_dimension_numbers<[1], [0], [0], [1], [0, 0, 1, 1], [], []>} : vector<16x128xbf16>, vector<128x128xbf16>, vector<16x128xf32> -> vector<16x128xf32>
    %5 = vector.shape_cast %4 : vector<16x128xf32> to vector<2x8x128xf32>
    %cst_4 = arith.constant dense<0xFF800000> : vector<2x128xf32>
    %6 = vector.multi_reduction <maximumf>, %5, %cst_4 [1] : vector<2x8x128xf32> to vector<2x128xf32>
    %7 = vector.shape_cast %6 : vector<2x128xf32> to vector<2x1x128xf32>
    %8 = vector.broadcast %7 : vector<2x1x128xf32> to vector<2x8x128xf32>
    %9 = arith.subf %5, %8 : vector<2x8x128xf32>
    %10 = math.exp %9 : vector<2x8x128xf32>
    %cst_5 = arith.constant dense<0.000000e+00> : vector<2x128xf32>
    %11 = vector.multi_reduction <add>, %10, %cst_5 [1] : vector<2x8x128xf32> to vector<2x128xf32>
    %12 = arith.mulf %0, %10 : vector<2x8x128xf32>
    %cst_6 = arith.constant dense<0.000000e+00> : vector<2x128xf32>
    %13 = vector.multi_reduction <add>, %12, %cst_6 [1] : vector<2x8x128xf32> to vector<2x128xf32>
    %14 = arith.divf %13, %11 : vector<2x128xf32>
    %cst_7 = arith.constant 1.250000e-01 : f32
    %15 = vector.broadcast %cst_7 : f32 to vector<2x128xf32>
    %16 = arith.mulf %14, %15 : vector<2x128xf32>
    %c0_8 = arith.constant 0 : index
    %c0_9 = arith.constant 0 : index
    %17 = vector.load %arg3[%c0_8, %c0_9] : memref<2x128xf32, #tpu.memory_space<vmem>>, vector<2x128xf32>
    tpu.vector_store %arg3[%c0_8, %c0_9], %16 {strides = array<i32>} : memref<2x128xf32, #tpu.memory_space<vmem>>, vector<2x128xf32>,
    return
  }
  func.func @transform_0(%arg0: i32) -> (i32, i32, i32) {
    %c0_i32 = arith.constant 0 : i32
    %c0_i32_0 = arith.constant 0 : i32
    %c0_i32_1 = arith.constant 0 : i32
    return %arg0, %c0_i32, %c0_i32_0 : i32, i32, i32
  }
  func.func @transform_1(%arg0: i32) -> (i32, i32) {
    %c0_i32 = arith.constant 0 : i32
    %c0_i32_0 = arith.constant 0 : i32
    %c0_i32_1 = arith.constant 0 : i32
    return %c0_i32, %c0_i32_0 : i32, i32
  }
  func.func @transform_2(%arg0: i32) -> (i32, i32) {
    %c0_i32 = arith.constant 0 : i32
    %c0_i32_0 = arith.constant 0 : i32
    return %arg0, %c0_i32 : i32, i32
  }
}

</mosaic_0001>

<bundles_post_ra>
// kernel: tpu_custom_call.1
= control target key start
LH: loop header
LB: loop body
LE: loop exit
PB: predicated region body
PF: predicated region fallthrough
CT: control target
= control target key end

     0   :  { %7 = vsyncpa [#allocation3], 0  ;;  %s415_s0 = inlined_call_operand.hbm [shape: f32[2,8,128], index: 0, kind: input, shape index: {}]   ;;  %s416_s1 = inlined_call_operand.hbm [shape: bf16[128,128], index: 1, kind: input, shape index: {}]   ;;  %s417_s2 = inlined_call_operand.hbm [shape: f32[2,128], index: 2, kind: output, shape index: {}]  }
   0x1   :  { %8 = vsyncpa [#allocation6], 0 }
   0x2   :  { %9 = vsyncpa [#allocation4], 0  ;;  %s355_s9 = smov [#allocation2]   ;;  %s283_s13 = scalar_lea.hbm %s415_s0, 256 }
   0x3   :  { %s15_s10 = sshll.u32 %s355_s9, 4  ;;  %p284_p0 = scmp.ne.s32.totalorder %s415_s0, %s283_s13  ;;  %s16_s10 = int_to_ptr.vmem [resolvable:$true] %s15_s10 }
   0x4   :  { %p287_p1 = scmp.lt.u32.totalorder %s283_s13, %s415_s0 }
   0x6   :  { %p289_p2 = pnand %p287_p1, %p284_p0 }
   0x8   :  { %292 = shalt.err (!%p289_p2)
}
   0x9   :  { %s293_s18 = scalar_lea.vmem %s16_s10, 256  ;;  %p298_p4 = scmp.lt.s32.totalorder %s16_s10, %s16_s10 }
   0xa   :  { %p294_p3 = scmp.ne.s32.totalorder %s16_s10, %s293_s18  ;;  %p299_p5 = scmp.lt.s32.totalorder %s293_s18, %s293_s18 }
   0xc   :  { %p300_p6 = por %p299_p5, %p298_p4 }
   0xe   :  { %p301_p7 = pnand %p300_p6, %p294_p3 }
  0x10   :  { %304 = shalt.err (!%p301_p7)
}
  0x11   :  { %s356_s19 = smov 128   ;;  %s357_s20 = smov 8  }
  0x12   :  { %21 = dma.hbm_to_vmem [thread:$0]  %s415_s0, 256, %s16_s10, [#allocation3], %s356_s19, %s356_s19, %s357_s20  }
  0x13   :  { %s358_s23 = smov [#allocation5]   ;;  %s305_s27 = scalar_lea.hbm %s416_s1, 1024 }
  0x14   :  { %s27_s24 = sshll.u32 %s358_s23, 4  ;;  %p306_p8 = scmp.ne.s32.totalorder %s416_s1, %s305_s27  ;;  %s28_s24 = int_to_ptr.vmem [resolvable:$true] %s27_s24 }
  0x15   :  { %p309_p9 = scmp.lt.u32.totalorder %s305_s27, %s416_s1 }
  0x17   :  { %p311_p10 = pnand %p309_p9, %p306_p8 }
  0x19   :  { %314 = shalt.err (!%p311_p10)
}
  0x1a   :  { %s315_s4 = scalar_lea.vmem %s28_s24, 1024  ;;  %p320_p12 = scmp.lt.s32.totalorder %s28_s24, %s28_s24 }
  0x1b   :  { %p316_p11 = scmp.ne.s32.totalorder %s28_s24, %s315_s4  ;;  %p321_p13 = scmp.lt.s32.totalorder %s315_s4, %s315_s4 }
  0x1d   :  { %p322_p0 = por %p321_p13, %p320_p12 }
  0x1f   :  { %p323_p1 = pnand %p322_p0, %p316_p11 }
  0x21   :  { %326 = shalt.err (!%p323_p1)
}
  0x22   :  { %s359_s0 = smov 64   ;;  %s360_s5 = smov 4  }
  0x23   :  { %33 = dma.hbm_to_vmem [thread:$0]  %s416_s1, 1024, %s28_s24, [#allocation6], %s359_s0, %s359_s0, %s360_s5  }
  0x24   :  { %349 = dma.done.wait [#allocation3], 256  }
  0x25   :  { %350 = vsyncadd [#allocation3], 4294967040 }
  0x26   :  { %351 = dma.done.wait [#allocation6], 1024  }
  0x27   :  { %352 = vsyncadd [#allocation6], 4294966272  ;;  %v361_v0 = vmov 0.0   ;;  %vm362_vm0 = vmmov 0   ;;  %v267_v1 = vld [vmem:[#allocation5] sm:$0xff]   ;;  %v268_v2 = vld [vmem:[#allocation5 + $0x8] sm:$0xff]  }
  0x28   :  { %238 = vmatprep.subr.bf16.mxu0 %v361_v0  ;;  %254 = vmatprep.mubr.msk.bf16.mxu0 %vm362_vm0, %v361_v0  ;;  %v269_v3 = vld [vmem:[#allocation5 + $0x10] sm:$0xff]   ;;  %v270_v4 = vld [vmem:[#allocation5 + $0x18] sm:$0xff]   ;;  %v271_v5 = vld [vmem:[#allocation5 + $0x20] sm:$0xff]   ;;  %s363_s1 = smov [#allocation7]   ;;  %vm201_vm1 = vcmask 1041409  }
  0x29   :  { %239 = vmatpush3.bf16.msra.mxu0 %v267_v1  ;;  %v272_v6 = vld [vmem:[#allocation5 + $0x28] sm:$0xff]   ;;  %v273_v7 = vld [vmem:[#allocation5 + $0x30] sm:$0xff]   ;;  %v274_v8 = vld [vmem:[#allocation5 + $0x38] sm:$0xff]   ;;  %s211_s8 = sshll.u32 %s363_s1, 4  ;;  %s212_s8 = int_to_ptr.vmem [resolvable:$true] %s211_s8 }
  0x2a   :  { %240 = vmatprep.subr.bf16.mxu0 %v361_v0  ;;  %v41_v9 = vld [vmem:[#allocation2] sm:$0xff]  ;;  %v42_v10 = vld [vmem:[#allocation2 + $0x8] sm:$0xff]  ;;  %s327_s9 = scalar_lea.vmem %s212_s8, 32  ;;  %p332_p3 = scmp.lt.s32.totalorder %s212_s8, %s212_s8 }
  0x2b   :  { %v43_v11 = vpack.c.bf16 %v42_v10, %v41_v9  ;;  %p328_p2 = scmp.ne.s32.totalorder %s212_s8, %s327_s9  ;;  %p333_p4 = scmp.lt.s32.totalorder %s327_s9, %s327_s9 }
  0x2d   :  { %241 = vmatpush3.bf16.msra.mxu0 %v268_v2  ;;  %p334_p5 = por %p333_p4, %p332_p3 }
  0x2e   :  { %242 = vmatprep.subr.bf16.mxu0 %v361_v0 }
  0x2f   :  { %p335_p6 = pnand %p334_p5, %p328_p2 }
  0x31   :  { %243 = vmatpush3.bf16.msra.mxu0 %v269_v3 }
  0x32   :  { %244 = vmatprep.subr.bf16.mxu0 %v361_v0 }
  0x35   :  { %245 = vmatpush3.bf16.msra.mxu0 %v270_v4 }
  0x36   :  { %246 = vmatprep.subr.bf16.mxu0 %v361_v0 }
  0x39   :  { %247 = vmatpush3.bf16.msra.mxu0 %v271_v5 }
  0x3a   :  { %248 = vmatprep.subr.bf16.mxu0 %v361_v0 }
  0x3d   :  { %249 = vmatpush3.bf16.msra.mxu0 %v272_v6 }
  0x3e   :  { %250 = vmatprep.subr.bf16.mxu0 %v361_v0 }
  0x41   :  { %251 = vmatpush3.bf16.msra.mxu0 %v273_v7 }
  0x42   :  { %252 = vmatprep.subr.bf16.mxu0 %v361_v0 }
  0x45   :  { %253 = vmatpush3.bf16.msra.mxu0 %v274_v8 }
  0x48   :  { %255 = vmatmul.mubr.bf16.vlgmr.msra.gmra.mrb[0].mxu0 %v43_v11 }
 0x11b   :  { %v142_v12 = vpop.f32.mrb[0].mxu0 }
 0x11c   :  { %v149_v13 = vrot.slane %v142_v12, 4  ;;  %v256_v14 = vpop.f32.mrb[1].mxu0 }
 0x11d   :  { %v145_v15 = vpop.f32.mrb[2].mxu0 }
 0x11e   :  { %v150_v16 = vmax.f32 %v142_v12, %v149_v13  ;;  %v155_v17 = vrot.slane %v145_v15, 4  ;;  %v257_v18 = vpop.f32.mrb[3].mxu0 }
 0x120   :  { %v151_v19 = vrot.slane %v150_v16, 2  ;;  %v156_v20 = vmax.f32 %v145_v15, %v155_v17 }
 0x122   :  { %v152_v21 = vmax.f32 %v150_v16, %v151_v19  ;;  %v157_v22 = vrot.slane %v156_v20, 2 }
 0x124   :  { %v153_v23 = vrot.slane %v152_v21, 1  ;;  %v158_v24 = vmax.f32 %v156_v20, %v157_v22 }
 0x126   :  { %v154_v25 = vmax.f32 %v152_v21, %v153_v23  ;;  %v159_v26 = vrot.slane %v158_v24, 1 }
 0x128   :  { %v161_v27 = vsub.f32 %v142_v12, %v154_v25  ;;  %v160_v28 = vmax.f32 %v158_v24, %v159_v26 }
 0x12a   :  { %v163_v29 = vmul.f32 1.442695, %v161_v27  ;;  %v162_v30 = vsub.f32 %v145_v15, %v160_v28 }
 0x12c   :  { %275 = vpow2.f32 %v163_v29  ;;  %v165_v31 = vmul.f32 1.442695, %v162_v30 }
 0x12e   :  { %277 = vpow2.f32 %v165_v31 }
 0x136   :  { %v276_v32 = vpop.eup %275 }
 0x137   :  { %v167_v33 = vrot.slane %v276_v32, 4  ;;  %v179_v34 = vmul.f32 %v276_v32, %v41_v9 }
 0x138   :  { %v278_v35 = vpop.eup %277 }
 0x139   :  { %v168_v36 = vadd.f32 %v276_v32, %v167_v33  ;;  %v173_v37 = vrot.slane %v278_v35, 4  ;;  %v180_v38 = vmul.f32 %v278_v35, %v42_v10  ;;  %v181_v39 = vrot.slane %v179_v34, 4 }
 0x13b   :  { %v169_v40 = vrot.slane %v168_v36, 2  ;;  %v174_v41 = vadd.f32 %v278_v35, %v173_v37  ;;  %v187_v42 = vrot.slane %v180_v38, 4  ;;  %v182_v43 = vadd.f32 %v181_v39, %v179_v34 }
 0x13d   :  { %v170_v44 = vadd.f32 %v169_v40, %v168_v36  ;;  %v175_v45 = vrot.slane %v174_v41, 2  ;;  %v188_v46 = vadd.f32 %v187_v42, %v180_v38  ;;  %v183_v49 = vrot.slane %v182_v43, 2 }
 0x13f   :  { %v171_v47 = vrot.slane %v170_v44, 1  ;;  %v176_v48 = vadd.f32 %v175_v45, %v174_v41  ;;  %v189_v52 = vrot.slane %v188_v46, 2  ;;  %v184_v54 = vadd.f32 %v183_v49, %v182_v43 }
 0x141   :  { %v172_v50 = vadd.f32 %v171_v47, %v170_v44  ;;  %v177_v51 = vrot.slane %v176_v48, 1  ;;  %v190_v55 = vadd.f32 %v189_v52, %v188_v46  ;;  %v185_v56 = vrot.slane %v184_v54, 1 }
 0x143   :  { %v178_v53 = vadd.f32 %v177_v51, %v176_v48  ;;  %279 = vrcp.f32 %v172_v50  ;;  %v191_v57 = vrot.slane %v190_v55, 1  ;;  %v186_v58 = vadd.f32 %v185_v56, %v184_v54 }
 0x145   :  { %281 = vrcp.f32 %v178_v53  ;;  %v192_v60 = vadd.f32 %v191_v57, %v190_v55 }
 0x14d   :  { %v280_v59 = vpop.eup %279 }
 0x14e   :  { %v194_v61 = vmul.f32 %v280_v59, %v186_v58 }
 0x14f   :  { %v282_v62 = vpop.eup %281 }
 0x150   :  { %v196_v63 = vmul.f32 %v282_v62, %v192_v60  ;;  %v197_v0 = vmul.f32 0.125, %v194_v61 }
 0x152   :  { %v198_v1 = vmul.f32 0.125, %v196_v63 }
 0x154   :  { %v202_v2 = vsel %vm201_vm1, %v198_v1, %v197_v0 }
 0x155   :  { %204 = vst [vmem:[#allocation7] sm:$0x3] %v202_v2 }
 0x156   :  { %338 = shalt.err (!%p335_p6)
}
 0x157   :  { %s339_s12 = scalar_lea.hbm %s417_s2, 32 }
 0x158   :  { %p340_p7 = scmp.ne.s32.totalorder %s417_s2, %s339_s12  ;;  %p343_p8 = scmp.lt.u32.totalorder %s339_s12, %s417_s2 }
 0x15a   :  { %p345_p9 = pnand %p343_p8, %p340_p7 }
 0x15c   :  { %348 = shalt.err (!%p345_p9)
}
 0x15d   :  { %214 = dma.vmem_to_hbm [thread:$0]  %s212_s8, 32, %s417_s2, [#allocation4]  }
 0x15e   :  { %353 = dma.done.wait [#allocation4], 32  }
 0x15f   :  { %354 = vsyncadd [#allocation4], 4294967264 }
 0x160   :  { %218 = vsyncpa [#allocation3], 1 }
 0x161   :  { %219 = vsyncpa [#allocation6], 1 }
 0x162   :  { %220 = vsyncpa [#allocation4], 1 }

// kernel: tpu_custom_call.1
= control target key start
LH: loop header
LB: loop body
LE: loop exit
PB: predicated region body
PF: predicated region fallthrough
CT: control target
= control target key end

     0   :  { %7 = vsyncpa [#allocation3], 0  ;;  %s415_s0 = inlined_call_operand.hbm [shape: f32[2,8,128], index: 0, kind: input, shape index: {}]   ;;  %s416_s1 = inlined_call_operand.hbm [shape: bf16[128,128], index: 1, kind: input, shape index: {}]   ;;  %s417_s2 = inlined_call_operand.hbm [shape: f32[2,128], index: 2, kind: output, shape index: {}]  }
   0x1   :  { %8 = vsyncpa [#allocation6], 0 }
   0x2   :  { %9 = vsyncpa [#allocation4], 0  ;;  %s355_s9 = smov [#allocation2]   ;;  %s283_s13 = scalar_lea.hbm %s415_s0, 256 }
   0x3   :  { %s15_s10 = sshll.u32 %s355_s9, 4  ;;  %p284_p0 = scmp.ne.s32.totalorder %s415_s0, %s283_s13  ;;  %s16_s10 = int_to_ptr.vmem [resolvable:$true] %s15_s10 }
   0x4   :  { %p287_p1 = scmp.lt.u32.totalorder %s283_s13, %s415_s0 }
   0x6   :  { %p289_p2 = pnand %p287_p1, %p284_p0 }
   0x8   :  { %292 = shalt.err (!%p289_p2)
}
   0x9   :  { %s293_s18 = scalar_lea.vmem %s16_s10, 256  ;;  %p298_p4 = scmp.lt.s32.totalorder %s16_s10, %s16_s10 }
   0xa   :  { %p294_p3 = scmp.ne.s32.totalorder %s16_s10, %s293_s18  ;;  %p299_p5 = scmp.lt.s32.totalorder %s293_s18, %s293_s18 }
   0xc   :  { %p300_p6 = por %p299_p5, %p298_p4 }
   0xe   :  { %p301_p7 = pnand %p300_p6, %p294_p3 }
  0x10   :  { %304 = shalt.err (!%p301_p7)
}
  0x11   :  { %s356_s19 = smov 128   ;;  %s357_s20 = smov 8  }
  0x12   :  { %21 = dma.hbm_to_vmem [thread:$0]  %s415_s0, 256, %s16_s10, [#allocation3], %s356_s19, %s356_s19, %s357_s20  }
  0x13   :  { %s358_s23 = smov [#allocation5]   ;;  %s305_s27 = scalar_lea.hbm %s416_s1, 1024 }
  0x14   :  { %s27_s24 = sshll.u32 %s358_s23, 4  ;;  %p306_p8 = scmp.ne.s32.totalorder %s416_s1, %s305_s27  ;;  %s28_s24 = int_to_ptr.vmem [resolvable:$true] %s27_s24 }
  0x15   :  { %p309_p9 = scmp.lt.u32.totalorder %s305_s27, %s416_s1 }
  0x17   :  { %p311_p10 = pnand %p309_p9, %p306_p8 }
  0x19   :  { %314 = shalt.err (!%p311_p10)
}
  0x1a   :  { %s315_s4 = scalar_lea.vmem %s28_s24, 1024  ;;  %p320_p12 = scmp.lt.s32.totalorder %s28_s24, %s28_s24 }
  0x1b   :  { %p316_p11 = scmp.ne.s32.totalorder %s28_s24, %s315_s4  ;;  %p321_p13 = scmp.lt.s32.totalorder %s315_s4, %s315_s4 }
  0x1d   :  { %p322_p0 = por %p321_p13, %p320_p12 }
  0x1f   :  { %p323_p1 = pnand %p322_p0, %p316_p11 }
  0x21   :  { %326 = shalt.err (!%p323_p1)
}
  0x22   :  { %s359_s0 = smov 64   ;;  %s360_s5 = smov 4  }
  0x23   :  { %33 = dma.hbm_to_vmem [thread:$0]  %s416_s1, 1024, %s28_s24, [#allocation6], %s359_s0, %s359_s0, %s360_s5  }
  0x24   :  { %349 = dma.done.wait [#allocation3], 256  }
  0x25   :  { %350 = vsyncadd [#allocation3], 4294967040 }
  0x26   :  { %351 = dma.done.wait [#allocation6], 1024  }
  0x27   :  { %352 = vsyncadd [#allocation6], 4294966272  ;;  %v361_v0 = vmov 0.0   ;;  %vm362_vm0 = vmmov 0   ;;  %v267_v1 = vld [vmem:[#allocation5] sm:$0xff]   ;;  %v268_v2 = vld [vmem:[#allocation5 + $0x8] sm:$0xff]  }
  0x28   :  { %238 = vmatprep.subr.bf16.mxu0 %v361_v0  ;;  %254 = vmatprep.mubr.msk.bf16.mxu0 %vm362_vm0, %v361_v0  ;;  %v269_v3 = vld [vmem:[#allocation5 + $0x10] sm:$0xff]   ;;  %v270_v4 = vld [vmem:[#allocation5 + $0x18] sm:$0xff]   ;;  %v271_v5 = vld [vmem:[#allocation5 + $0x20] sm:$0xff]   ;;  %s363_s1 = smov [#allocation7]   ;;  %vm201_vm1 = vcmask 1041409  }
  0x29   :  { %239 = vmatpush3.bf16.msra.mxu0 %v267_v1  ;;  %v272_v6 = vld [vmem:[#allocation5 + $0x28] sm:$0xff]   ;;  %v273_v7 = vld [vmem:[#allocation5 + $0x30] sm:$0xff]   ;;  %v274_v8 = vld [vmem:[#allocation5 + $0x38] sm:$0xff]   ;;  %s211_s8 = sshll.u32 %s363_s1, 4  ;;  %s212_s8 = int_to_ptr.vmem [resolvable:$true] %s211_s8 }
  0x2a   :  { %240 = vmatprep.subr.bf16.mxu0 %v361_v0  ;;  %v41_v9 = vld [vmem:[#allocation2] sm:$0xff]  ;;  %v42_v10 = vld [vmem:[#allocation2 + $0x8] sm:$0xff]  ;;  %s327_s9 = scalar_lea.vmem %s212_s8, 32  ;;  %p332_p3 = scmp.lt.s32.totalorder %s212_s8, %s212_s8 }
  0x2b   :  { %v43_v11 = vpack.c.bf16 %v42_v10, %v41_v9  ;;  %p328_p2 = scmp.ne.s32.totalorder %s212_s8, %s327_s9  ;;  %p333_p4 = scmp.lt.s32.totalorder %s327_s9, %s327_s9 }
  0x2d   :  { %241 = vmatpush3.bf16.msra.mxu0 %v268_v2  ;;  %p334_p5 = por %p333_p4, %p332_p3 }
  0x2e   :  { %242 = vmatprep.subr.bf16.mxu0 %v361_v0 }
  0x2f   :  { %p335_p6 = pnand %p334_p5, %p328_p2 }
  0x31   :  { %243 = vmatpush3.bf16.msra.mxu0 %v269_v3 }
  0x32   :  { %244 = vmatprep.subr.bf16.mxu0 %v361_v0 }
  0x35   :  { %245 = vmatpush3.bf16.msra.mxu0 %v270_v4 }
  0x36   :  { %246 = vmatprep.subr.bf16.mxu0 %v361_v0 }
  0x39   :  { %247 = vmatpush3.bf16.msra.mxu0 %v271_v5 }
  0x3a   :  { %248 = vmatprep.subr.bf16.mxu0 %v361_v0 }
  0x3d   :  { %249 = vmatpush3.bf16.msra.mxu0 %v272_v6 }
  0x3e   :  { %250 = vmatprep.subr.bf16.mxu0 %v361_v0 }
  0x41   :  { %251 = vmatpush3.bf16.msra.mxu0 %v273_v7 }
  0x42   :  { %252 = vmatprep.subr.bf16.mxu0 %v361_v0 }
  0x45   :  { %253 = vmatpush3.bf16.msra.mxu0 %v274_v8 }
  0x48   :  { %255 = vmatmul.mubr.bf16.vlgmr.msra.gmra.mrb[0].mxu0 %v43_v11 }
 0x11b   :  { %v142_v12 = vpop.f32.mrb[0].mxu0 }
 0x11c   :  { %v149_v13 = vrot.slane %v142_v12, 4  ;;  %v256_v14 = vpop.f32.mrb[1].mxu0 }
 0x11d   :  { %v145_v15 = vpop.f32.mrb[2].mxu0 }
 0x11e   :  { %v150_v16 = vmax.f32 %v142_v12, %v149_v13  ;;  %v155_v17 = vrot.slane %v145_v15, 4  ;;  %v257_v18 = vpop.f32.mrb[3].mxu0 }
 0x120   :  { %v151_v19 = vrot.slane %v150_v16, 2  ;;  %v156_v20 = vmax.f32 %v145_v15, %v155_v17 }
 0x122   :  { %v152_v21 = vmax.f32 %v150_v16, %v151_v19  ;;  %v157_v22 = vrot.slane %v156_v20, 2 }
 0x124   :  { %v153_v23 = vrot.slane %v152_v21, 1  ;;  %v158_v24 = vmax.f32 %v156_v20, %v157_v22 }
 0x126   :  { %v154_v25 = vmax.f32 %v152_v21, %v153_v23  ;;  %v159_v26 = vrot.slane %v158_v24, 1 }
 0x128   :  { %v161_v27 = vsub.f32 %v142_v12, %v154_v25  ;;  %v160_v28 = vmax.f32 %v158_v24, %v159_v26 }
 0x12a   :  { %v163_v29 = vmul.f32 1.442695, %v161_v27  ;;  %v162_v30 = vsub.f32 %v145_v15, %v160_v28 }
 0x12c   :  { %275 = vpow2.f32 %v163_v29  ;;  %v165_v31 = vmul.f32 1.442695, %v162_v30 }
 0x12e   :  { %277 = vpow2.f32 %v165_v31 }
 0x136   :  { %v276_v32 = vpop.eup %275 }
 0x137   :  { %v167_v33 = vrot.slane %v276_v32, 4  ;;  %v179_v34 = vmul.f32 %v276_v32, %v41_v9 }
 0x138   :  { %v278_v35 = vpop.eup %277 }
 0x139   :  { %v168_v36 = vadd.f32 %v276_v32, %v167_v33  ;;  %v173_v37 = vrot.slane %v278_v35, 4  ;;  %v180_v38 = vmul.f32 %v278_v35, %v42_v10  ;;  %v181_v39 = vrot.slane %v179_v34, 4 }
 0x13b   :  { %v169_v40 = vrot.slane %v168_v36, 2  ;;  %v174_v41 = vadd.f32 %v278_v35, %v173_v37  ;;  %v187_v42 = vrot.slane %v180_v38, 4  ;;  %v182_v43 = vadd.f32 %v181_v39, %v179_v34 }
 0x13d   :  { %v170_v44 = vadd.f32 %v169_v40, %v168_v36  ;;  %v175_v45 = vrot.slane %v174_v41, 2  ;;  %v188_v46 = vadd.f32 %v187_v42, %v180_v38  ;;  %v183_v49 = vrot.slane %v182_v43, 2 }
 0x13f   :  { %v171_v47 = vrot.slane %v170_v44, 1  ;;  %v176_v48 = vadd.f32 %v175_v45, %v174_v41  ;;  %v189_v52 = vrot.slane %v188_v46, 2  ;;  %v184_v54 = vadd.f32 %v183_v49, %v182_v43 }
 0x141   :  { %v172_v50 = vadd.f32 %v171_v47, %v170_v44  ;;  %v177_v51 = vrot.slane %v176_v48, 1  ;;  %v190_v55 = vadd.f32 %v189_v52, %v188_v46  ;;  %v185_v56 = vrot.slane %v184_v54, 1 }
 0x143   :  { %v178_v53 = vadd.f32 %v177_v51, %v176_v48  ;;  %279 = vrcp.f32 %v172_v50  ;;  %v191_v57 = vrot.slane %v190_v55, 1  ;;  %v186_v58 = vadd.f32 %v185_v56, %v184_v54 }
 0x145   :  { %281 = vrcp.f32 %v178_v53  ;;  %v192_v60 = vadd.f32 %v191_v57, %v190_v55 }
 0x14d   :  { %v280_v59 = vpop.eup %279 }
 0x14e   :  { %v194_v61 = vmul.f32 %v280_v59, %v186_v58 }
 0x14f   :  { %v282_v62 = vpop.eup %281 }
 0x150   :  { %v196_v63 = vmul.f32 %v282_v62, %v192_v60  ;;  %v197_v0 = vmul.f32 0.125, %v194_v61 }
 0x152   :  { %v198_v1 = vmul.f32 0.125, %v196_v63 }
 0x154   :  { %v202_v2 = vsel %vm201_vm1, %v198_v1, %v197_v0 }
 0x155   :  { %204 = vst [vmem:[#allocation7] sm:$0x3] %v202_v2 }
 0x156   :  { %338 = shalt.err (!%p335_p6)
}
 0x157   :  { %s339_s12 = scalar_lea.hbm %s417_s2, 32 }
 0x158   :  { %p340_p7 = scmp.ne.s32.totalorder %s417_s2, %s339_s12  ;;  %p343_p8 = scmp.lt.u32.totalorder %s339_s12, %s417_s2 }
 0x15a   :  { %p345_p9 = pnand %p343_p8, %p340_p7 }
 0x15c   :  { %348 = shalt.err (!%p345_p9)
}
 0x15d   :  { %214 = dma.vmem_to_hbm [thread:$0]  %s212_s8, 32, %s417_s2, [#allocation4]  }
 0x15e   :  { %353 = dma.done.wait [#allocation4], 32  }
 0x15f   :  { %354 = vsyncadd [#allocation4], 4294967264 }
 0x160   :  { %218 = vsyncpa [#allocation3], 1 }
 0x161   :  { %219 = vsyncpa [#allocation6], 1 }
 0x162   :  { %220 = vsyncpa [#allocation4], 1 }

</bundles_post_ra>
